<compile_context>
chip_gen: v5e
topology: v5e:2x2
jax: 0.10.0
libtpu: 0.0.40
codegen_flags: <defaults>
</compile_context>

<pallas_src>
import jax
import jax.numpy as jnp
from jax.experimental import pallas as pl
from jax.experimental.pallas import tpu as pltpu


def _round_up(x, m):
    return (x + m - 1) // m * m


def _ctx_tree_kernel(he_ref, e1wh_ref, e1_ref, ca_ref, hem_ref, cam_ref,
                     w1_ref, b1_ref, w2_ref, b2_ref, w3_ref, b3_ref, out_ref):
    f32 = jnp.float32
    twoh = he_ref.shape[1]          # 2H
    h = w3_ref.shape[1]             # H

    # Layer 1: cat(he, e1wh) @ W1 split into two half-K matmuls (no concat).
    he_e1wh = jnp.dot(he_ref[...], w1_ref[:twoh, :], preferred_element_type=f32)
    he_e1wh = he_e1wh + jnp.dot(e1wh_ref[...], w1_ref[twoh:, :],
                                preferred_element_type=f32)
    he_e1wh = jnp.maximum(he_e1wh + b1_ref[...], 0.0) * hem_ref[...]

    # Layer 2: cat(e1, ca) @ W2.  The `* ca_mask` here is dropped: masks are
    # {0,1} and the final output is scaled by ca_mask anyway, so the result is
    # identical.
    e1_ca = jnp.dot(e1_ref[...], w2_ref[:twoh, :], preferred_element_type=f32)
    e1_ca = e1_ca + jnp.dot(ca_ref[...], w2_ref[twoh:, :],
                            preferred_element_type=f32)
    e1_ca = jnp.maximum(e1_ca + b2_ref[...], 0.0)

    # Layer 3: cat(he_e1wh, e1_ca) @ W3, again as two half-K matmuls.
    enc = jnp.dot(he_e1wh, w3_ref[:h, :], preferred_element_type=f32)
    enc = enc + jnp.dot(e1_ca, w3_ref[h:, :], preferred_element_type=f32)
    enc = jnp.maximum(enc + b3_ref[...], 0.0) * cam_ref[...]
    out_ref[...] = enc.astype(out_ref.dtype)


def ctx_path_encoder(he_rep, e1wh_rep, e1_rep, ca_rep,
                     he_mask, e1wh_mask, e1_mask, ca_mask,
                     params, *, enc_type="tree", block_m=2048):
    """
    he_rep, e1wh_rep, e1_rep, ca_rep : (BCP, 2H) float32
    he_mask, e1wh_mask, e1_mask, ca_mask : (BCP, 1) {0,1} masks
    params: W1 (4H,H), b1 (H,), W2 (4H,H), b2 (H,), W3 (2H,H), b3 (H,)
    returns: (BCP, H) float32
    """
    del e1wh_mask, e1_mask  # unused by the 'tree' paths (same as PyTorch module)
    if enc_type not in ("tree", "tree_shared"):
        # TODO(synk): 'rnn' / 'rnn_delim' branches not kernelized.
        raise NotImplementedError(enc_type)

    bcp, twoh = he_rep.shape
    h = twoh // 2

    w1, b1 = params["W1"], params["b1"]
    if enc_type == "tree_shared":
        w2, b2 = w1, b1
    else:
        w2, b2 = params["W2"], params["b2"]
    w3, b3 = params["W3"], params["b3"]

    w1 = w1.astype(jnp.float32)
    w2 = w2.astype(jnp.float32)
    w3 = w3.astype(jnp.float32)
    b1 = b1.reshape(1, h).astype(jnp.float32)
    b2 = b2.reshape(1, h).astype(jnp.float32)
    b3 = b3.reshape(1, h).astype(jnp.float32)

    he = he_rep.astype(jnp.float32)
    e1wh = e1wh_rep.astype(jnp.float32)
    e1 = e1_rep.astype(jnp.float32)
    ca = ca_rep.astype(jnp.float32)
    hem = he_mask.astype(jnp.float32)
    cam = ca_mask.astype(jnp.float32)

    # Row tiling: large blocks amortize per-step grid overhead; keep >= 2 grid
    # steps when possible so the "parallel" axis can shard across v7x's two
    # TensorCores.  Pad BCP (full-copy cost, only when not divisible) instead
    # of asserting divisibility.
    block_m = max(8, _round_up(block_m, 8))
    bm = min(block_m, _round_up(max(-(-bcp // 2), 8), 8))
    bcp_pad = _round_up(bcp, bm)
    if bcp_pad != bcp:
        pad = ((0, bcp_pad - bcp), (0, 0))
        he, e1wh, e1, ca = (jnp.pad(a, pad) for a in (he, e1wh, e1, ca))
        hem = jnp.pad(hem, pad)
        cam = jnp.pad(cam, pad)
    grid = (bcp_pad // bm,)

    row_spec = pl.BlockSpec((bm, twoh), lambda i: (i, 0))
    mask_spec = pl.BlockSpec((bm, 1), lambda i: (i, 0))

    out = pl.pallas_call(
        _ctx_tree_kernel,
        out_shape=jax.ShapeDtypeStruct((bcp_pad, h), jnp.float32),
        grid=grid,
        in_specs=[
            row_spec,                                       # he
            row_spec,                                       # e1wh
            row_spec,                                       # e1
            row_spec,                                       # ca
            mask_spec,                                      # he_mask
            mask_spec,                                      # ca_mask
            pl.BlockSpec((2 * twoh, h), lambda i: (0, 0)),  # W1 (resident)
            pl.BlockSpec((1, h), lambda i: (0, 0)),         # b1
            pl.BlockSpec((2 * twoh, h), lambda i: (0, 0)),  # W2 (resident)
            pl.BlockSpec((1, h), lambda i: (0, 0)),         # b2
            pl.BlockSpec((twoh, h), lambda i: (0, 0)),      # W3 (resident)
            pl.BlockSpec((1, h), lambda i: (0, 0)),         # b3
        ],
        out_specs=pl.BlockSpec((bm, h), lambda i: (i, 0)),
        compiler_params=pltpu.CompilerParams(
            dimension_semantics=("parallel",),
            vmem_limit_bytes=32 * 1024 * 1024),
    )(he, e1wh, e1, ca, hem, cam, w1, b1, w2, b2, w3, b3)
    return out[:bcp]


def _reference(he, e1wh, e1, ca, hem, cam, params):
    def ff(x, w, b):
        return jnp.maximum(x @ w + b, 0.0)
    he_e1wh = ff(jnp.concatenate([he, e1wh], 1), params["W1"], params["b1"]) * hem
    e1_ca = ff(jnp.concatenate([e1, ca], 1), params["W2"], params["b2"]) * cam
    enc = ff(jnp.concatenate([he_e1wh, e1_ca], 1), params["W3"], params["b3"]) * cam
    return enc


if __name__ == "__main__":
    key = jax.random.PRNGKey(0)
    BCP, H = 64, 32           # BCP = batch * num_candidates * num_paths
    TWO_H = 2 * H

    ks = jax.random.split(key, 16)
    he_rep = jax.random.normal(ks[0], (BCP, TWO_H), jnp.float32)
    e1wh_rep = jax.random.normal(ks[1], (BCP, TWO_H), jnp.float32)
    e1_rep = jax.random.normal(ks[2], (BCP, TWO_H), jnp.float32)
    ca_rep = jax.random.normal(ks[3], (BCP, TWO_H), jnp.float32)
    he_mask = (jax.random.uniform(ks[4], (BCP, 1)) > 0.2).astype(jnp.float32)
    ca_mask = (jax.random.uniform(ks[5], (BCP, 1)) > 0.2).astype(jnp.float32)
    e1wh_mask = (jax.random.uniform(ks[12], (BCP, 1)) > 0.2).astype(jnp.float32)
    e1_mask = (jax.random.uniform(ks[13], (BCP, 1)) > 0.2).astype(jnp.float32)

    params = {
        "W1": jax.random.normal(ks[6], (2 * TWO_H, H), jnp.float32) * 0.1,
        "b1": jax.random.normal(ks[7], (H,), jnp.float32) * 0.1,
        "W2": jax.random.normal(ks[8], (2 * TWO_H, H), jnp.float32) * 0.1,
        "b2": jax.random.normal(ks[9], (H,), jnp.float32) * 0.1,
        "W3": jax.random.normal(ks[10], (2 * H, H), jnp.float32) * 0.1,
        "b3": jax.random.normal(ks[11], (H,), jnp.float32) * 0.1,
    }

    out = ctx_path_encoder(he_rep, e1wh_rep, e1_rep, ca_rep,
                           he_mask, e1wh_mask, e1_mask, ca_mask,
                           params, enc_type="tree")
    out = jax.block_until_ready(out)

    ref = _reference(he_rep, e1wh_rep, e1_rep, ca_rep, he_mask, ca_mask, params)
    assert out.shape == (BCP, H)
    assert jnp.allclose(out, ref, atol=2e-5, rtol=2e-5), "mismatch vs reference"

    # Also exercise the shared-weight variant once.
    out_shared = jax.block_until_ready(
        ctx_path_encoder(he_rep, e1wh_rep, e1_rep, ca_rep,
                         he_mask, e1wh_mask, e1_mask, ca_mask,
                         params, enc_type="tree_shared"))
    params_shared = dict(params, W2=params["W1"], b2=params["b1"])
    ref_shared = _reference(he_rep, e1wh_rep, e1_rep, ca_rep,
                            he_mask, ca_mask, params_shared)
    assert jnp.allclose(out_shared, ref_shared, atol=2e-5, rtol=2e-5), \
        "mismatch vs reference (tree_shared)"
    print("KERNEL_OK")
</pallas_src>

<mosaic_0001>
module attributes {stable_mosaic.version = 11 : i64} {
  func.func @_ctx_tree_kernel(%arg0: i32, %arg1: memref<32x64xf32, #tpu.memory_space<vmem>>, %arg2: memref<32x64xf32, #tpu.memory_space<vmem>>, %arg3: memref<32x64xf32, #tpu.memory_space<vmem>>, %arg4: memref<32x64xf32, #tpu.memory_space<vmem>>, %arg5: memref<32x1xf32, #tpu.memory_space<vmem>>, %arg6: memref<32x1xf32, #tpu.memory_space<vmem>>, %arg7: memref<128x32xf32, #tpu.memory_space<vmem>>, %arg8: memref<1x32xf32, #tpu.memory_space<vmem>>, %arg9: memref<128x32xf32, #tpu.memory_space<vmem>>, %arg10: memref<1x32xf32, #tpu.memory_space<vmem>>, %arg11: memref<64x32xf32, #tpu.memory_space<vmem>>, %arg12: memref<1x32xf32, #tpu.memory_space<vmem>>, %arg13: memref<32x32xf32, #tpu.memory_space<vmem>>) attributes {dimension_semantics = [#tpu.dimension_semantics<parallel>], iteration_bounds = array<i64: 2>, scalar_prefetch = 0 : i64, scratch_operands = 0 : i64, tpu.core_type = #tpu.core_type<tc>, window_params = [{transform_indices = @transform_0, window_bounds = array<i64: 32, 64>}, {transform_indices = @transform_1, window_bounds = array<i64: 32, 64>}, {transform_indices = @transform_2, window_bounds = array<i64: 32, 64>}, {transform_indices = @transform_3, window_bounds = array<i64: 32, 64>}, {transform_indices = @transform_4, window_bounds = array<i64: 32, 1>}, {transform_indices = @transform_5, window_bounds = array<i64: 32, 1>}, {pipeline_mode = #tpu.pipeline_mode<synchronous>, transform_indices = @transform_6, window_bounds = array<i64: 128, 32>}, {pipeline_mode = #tpu.pipeline_mode<synchronous>, transform_indices = @transform_7, window_bounds = array<i64: 1, 32>}, {pipeline_mode = #tpu.pipeline_mode<synchronous>, transform_indices = @transform_8, window_bounds = array<i64: 128, 32>}, {pipeline_mode = #tpu.pipeline_mode<synchronous>, transform_indices = @transform_9, window_bounds = array<i64: 1, 32>}, {pipeline_mode = #tpu.pipeline_mode<synchronous>, transform_indices = @transform_10, window_bounds = array<i64: 64, 32>}, {pipeline_mode = #tpu.pipeline_mode<synchronous>, transform_indices = @transform_11, window_bounds = array<i64: 1, 32>}, {transform_indices = @transform_12, window_bounds = array<i64: 32, 32>}]} {
    %c0 = arith.constant 0 : index
    %c0_0 = arith.constant 0 : index
    %0 = vector.load %arg1[%c0, %c0_0] : memref<32x64xf32, #tpu.memory_space<vmem>>, vector<32x64xf32>
    %c0_1 = arith.constant 0 : index
    %c0_2 = arith.constant 0 : index
    %1 = vector.load %arg7[%c0_1, %c0_2] : memref<128x32xf32, #tpu.memory_space<vmem>>, vector<64x32xf32>
    %cst = arith.constant dense<0.000000e+00> : vector<32x32xf32>
    %2 = tpu.matmul %0, %1, %cst {dimension_numbers = #tpu.dot_dimension_numbers<[1], [0], [0], [1], [0, 0, 1, 1], [], []>} : vector<32x64xf32>, vector<64x32xf32>, vector<32x32xf32> -> vector<32x32xf32>
    %c0_3 = arith.constant 0 : index
    %c0_4 = arith.constant 0 : index
    %3 = vector.load %arg2[%c0_3, %c0_4] : memref<32x64xf32, #tpu.memory_space<vmem>>, vector<32x64xf32>
    %c64 = arith.constant 64 : index
    %c0_5 = arith.constant 0 : index
    %4 = vector.load %arg7[%c64, %c0_5] : memref<128x32xf32, #tpu.memory_space<vmem>>, vector<64x32xf32>
    %cst_6 = arith.constant dense<0.000000e+00> : vector<32x32xf32>
    %5 = tpu.matmul %3, %4, %cst_6 {dimension_numbers = #tpu.dot_dimension_numbers<[1], [0], [0], [1], [0, 0, 1, 1], [], []>} : vector<32x64xf32>, vector<64x32xf32>, vector<32x32xf32> -> vector<32x32xf32>
    %6 = arith.addf %2, %5 : vector<32x32xf32>
    %c0_7 = arith.constant 0 : index
    %c0_8 = arith.constant 0 : index
    %7 = vector.load %arg8[%c0_7, %c0_8] : memref<1x32xf32, #tpu.memory_space<vmem>>, vector<1x32xf32>
    %8 = vector.broadcast %7 : vector<1x32xf32> to vector<32x32xf32>
    %9 = arith.addf %6, %8 : vector<32x32xf32>
    %cst_9 = arith.constant 0.000000e+00 : f32
    %10 = vector.broadcast %cst_9 : f32 to vector<32x32xf32>
    %11 = arith.maximumf %9, %10 : vector<32x32xf32>
    %c0_10 = arith.constant 0 : index
    %c0_11 = arith.constant 0 : index
    %12 = vector.load %arg5[%c0_10, %c0_11] : memref<32x1xf32, #tpu.memory_space<vmem>>, vector<32x1xf32>
    %13 = vector.broadcast %12 : vector<32x1xf32> to vector<32x32xf32>
    %14 = arith.mulf %11, %13 : vector<32x32xf32>
    %c0_12 = arith.constant 0 : index
    %c0_13 = arith.constant 0 : index
    %15 = vector.load %arg3[%c0_12, %c0_13] : memref<32x64xf32, #tpu.memory_space<vmem>>, vector<32x64xf32>
    %c0_14 = arith.constant 0 : index
    %c0_15 = arith.constant 0 : index
    %16 = vector.load %arg9[%c0_14, %c0_15] : memref<128x32xf32, #tpu.memory_space<vmem>>, vector<64x32xf32>
    %cst_16 = arith.constant dense<0.000000e+00> : vector<32x32xf32>
    %17 = tpu.matmul %15, %16, %cst_16 {dimension_numbers = #tpu.dot_dimension_numbers<[1], [0], [0], [1], [0, 0, 1, 1], [], []>} : vector<32x64xf32>, vector<64x32xf32>, vector<32x32xf32> -> vector<32x32xf32>
    %c0_17 = arith.constant 0 : index
    %c0_18 = arith.constant 0 : index
    %18 = vector.load %arg4[%c0_17, %c0_18] : memref<32x64xf32, #tpu.memory_space<vmem>>, vector<32x64xf32>
    %c64_19 = arith.constant 64 : index
    %c0_20 = arith.constant 0 : index
    %19 = vector.load %arg9[%c64_19, %c0_20] : memref<128x32xf32, #tpu.memory_space<vmem>>, vector<64x32xf32>
    %cst_21 = arith.constant dense<0.000000e+00> : vector<32x32xf32>
    %20 = tpu.matmul %18, %19, %cst_21 {dimension_numbers = #tpu.dot_dimension_numbers<[1], [0], [0], [1], [0, 0, 1, 1], [], []>} : vector<32x64xf32>, vector<64x32xf32>, vector<32x32xf32> -> vector<32x32xf32>
    %21 = arith.addf %17, %20 : vector<32x32xf32>
    %c0_22 = arith.constant 0 : index
    %c0_23 = arith.constant 0 : index
    %22 = vector.load %arg10[%c0_22, %c0_23] : memref<1x32xf32, #tpu.memory_space<vmem>>, vector<1x32xf32>
    %23 = vector.broadcast %22 : vector<1x32xf32> to vector<32x32xf32>
    %24 = arith.addf %21, %23 : vector<32x32xf32>
    %cst_24 = arith.constant 0.000000e+00 : f32
    %25 = vector.broadcast %cst_24 : f32 to vector<32x32xf32>
    %26 = arith.maximumf %24, %25 : vector<32x32xf32>
    %c0_25 = arith.constant 0 : index
    %c0_26 = arith.constant 0 : index
    %27 = vector.load %arg11[%c0_25, %c0_26] : memref<64x32xf32, #tpu.memory_space<vmem>>, vector<32x32xf32>
    %cst_27 = arith.constant dense<0.000000e+00> : vector<32x32xf32>
    %28 = tpu.matmul %14, %27, %cst_27 {dimension_numbers = #tpu.dot_dimension_numbers<[1], [0], [0], [1], [0, 0, 1, 1], [], []>} : vector<32x32xf32>, vector<32x32xf32>, vector<32x32xf32> -> vector<32x32xf32>
    %c32 = arith.constant 32 : index
    %c0_28 = arith.constant 0 : index
    %29 = vector.load %arg11[%c32, %c0_28] : memref<64x32xf32, #tpu.memory_space<vmem>>, vector<32x32xf32>
    %cst_29 = arith.constant dense<0.000000e+00> : vector<32x32xf32>
    %30 = tpu.matmul %26, %29, %cst_29 {dimension_numbers = #tpu.dot_dimension_numbers<[1], [0], [0], [1], [0, 0, 1, 1], [], []>} : vector<32x32xf32>, vector<32x32xf32>, vector<32x32xf32> -> vector<32x32xf32>
    %31 = arith.addf %28, %30 : vector<32x32xf32>
    %c0_30 = arith.constant 0 : index
    %c0_31 = arith.constant 0 : index
    %32 = vector.load %arg12[%c0_30, %c0_31] : memref<1x32xf32, #tpu.memory_space<vmem>>, vector<1x32xf32>
    %33 = vector.broadcast %32 : vector<1x32xf32> to vector<32x32xf32>
    %34 = arith.addf %31, %33 : vector<32x32xf32>
    %cst_32 = arith.constant 0.000000e+00 : f32
    %35 = vector.broadcast %cst_32 : f32 to vector<32x32xf32>
    %36 = arith.maximumf %34, %35 : vector<32x32xf32>
    %c0_33 = arith.constant 0 : index
    %c0_34 = arith.constant 0 : index
    %37 = vector.load %arg6[%c0_33, %c0_34] : memref<32x1xf32, #tpu.memory_space<vmem>>, vector<32x1xf32>
    %38 = vector.broadcast %37 : vector<32x1xf32> to vector<32x32xf32>
    %39 = arith.mulf %36, %38 : vector<32x32xf32>
    %c0_35 = arith.constant 0 : index
    %c0_36 = arith.constant 0 : index
    %40 = vector.load %arg13[%c0_35, %c0_36] : memref<32x32xf32, #tpu.memory_space<vmem>>, vector<32x32xf32>
    tpu.vector_store %arg13[%c0_35, %c0_36], %39 {strides = array<i32>} : memref<32x32xf32, #tpu.memory_space<vmem>>, vector<32x32xf32>,
    return
  }
  func.func @transform_0(%arg0: i32) -> (i32, i32) {
    %c0_i32 = arith.constant 0 : i32
    %c0_i32_0 = arith.constant 0 : i32
    return %arg0, %c0_i32 : i32, i32
  }
  func.func @transform_1(%arg0: i32) -> (i32, i32) {
    %c0_i32 = arith.constant 0 : i32
    %c0_i32_0 = arith.constant 0 : i32
    return %arg0, %c0_i32 : i32, i32
  }
  func.func @transform_2(%arg0: i32) -> (i32, i32) {
    %c0_i32 = arith.constant 0 : i32
    %c0_i32_0 = arith.constant 0 : i32
    return %arg0, %c0_i32 : i32, i32
  }
  func.func @transform_3(%arg0: i32) -> (i32, i32) {
    %c0_i32 = arith.constant 0 : i32
    %c0_i32_0 = arith.constant 0 : i32
    return %arg0, %c0_i32 : i32, i32
  }
  func.func @transform_4(%arg0: i32) -> (i32, i32) {
    %c0_i32 = arith.constant 0 : i32
    %c0_i32_0 = arith.constant 0 : i32
    return %arg0, %c0_i32 : i32, i32
  }
  func.func @transform_5(%arg0: i32) -> (i32, i32) {
    %c0_i32 = arith.constant 0 : i32
    %c0_i32_0 = arith.constant 0 : i32
    return %arg0, %c0_i32 : i32, i32
  }
  func.func @transform_6(%arg0: i32) -> (i32, i32) {
    %c0_i32 = arith.constant 0 : i32
    %c0_i32_0 = arith.constant 0 : i32
    %c0_i32_1 = arith.constant 0 : i32
    return %c0_i32, %c0_i32_0 : i32, i32
  }
  func.func @transform_7(%arg0: i32) -> (i32, i32) {
    %c0_i32 = arith.constant 0 : i32
    %c0_i32_0 = arith.constant 0 : i32
    %c0_i32_1 = arith.constant 0 : i32
    return %c0_i32, %c0_i32_0 : i32, i32
  }
  func.func @transform_8(%arg0: i32) -> (i32, i32) {
    %c0_i32 = arith.constant 0 : i32
    %c0_i32_0 = arith.constant 0 : i32
    %c0_i32_1 = arith.constant 0 : i32
    return %c0_i32, %c0_i32_0 : i32, i32
  }
  func.func @transform_9(%arg0: i32) -> (i32, i32) {
    %c0_i32 = arith.constant 0 : i32
    %c0_i32_0 = arith.constant 0 : i32
    %c0_i32_1 = arith.constant 0 : i32
    return %c0_i32, %c0_i32_0 : i32, i32
  }
  func.func @transform_10(%arg0: i32) -> (i32, i32) {
    %c0_i32 = arith.constant 0 : i32
    %c0_i32_0 = arith.constant 0 : i32
    %c0_i32_1 = arith.constant 0 : i32
    return %c0_i32, %c0_i32_0 : i32, i32
  }
  func.func @transform_11(%arg0: i32) -> (i32, i32) {
    %c0_i32 = arith.constant 0 : i32
    %c0_i32_0 = arith.constant 0 : i32
    %c0_i32_1 = arith.constant 0 : i32
    return %c0_i32, %c0_i32_0 : i32, i32
  }
  func.func @transform_12(%arg0: i32) -> (i32, i32) {
    %c0_i32 = arith.constant 0 : i32
    %c0_i32_0 = arith.constant 0 : i32
    return %arg0, %c0_i32 : i32, i32
  }
}

</mosaic_0001>

<bundles_post_ra>
// kernel: tpu_custom_call.1
= control target key start
LH: loop header
LB: loop body
LE: loop exit
PB: predicated region body
PF: predicated region fallthrough
CT: control target
= control target key end

     0   :  { %s1193_s21 = smov 0   ;;  %s1415_s0 = inlined_call_operand.vmem [shape: f32[64,64], index: 0, kind: input, shape index: {}]   ;;  %s1416_s1 = inlined_call_operand.vmem [shape: f32[64,64], index: 1, kind: input, shape index: {}]   ;;  %s1417_s2 = inlined_call_operand.vmem [shape: f32[64,64], index: 2, kind: input, shape index: {}]   ;;  %s1418_s3 = inlined_call_operand.vmem [shape: f32[64,64], index: 3, kind: input, shape index: {}]   ;;  %s1419_s4 = inlined_call_operand.vmem [shape: f32[64,1], index: 4, kind: input, shape index: {}]   ;;  %s1420_s5 = inlined_call_operand.vmem [shape: f32[64,1], index: 5, kind: input, shape index: {}]   ;;  %s1421_s6 = inlined_call_operand.vmem [shape: f32[128,32], index: 6, kind: input, shape index: {}]   ;;  %s1422_s7 = inlined_call_operand.vmem [shape: f32[1,32], index: 7, kind: input, shape index: {}]   ;;  %s1423_s8 = inlined_call_operand.vmem [shape: f32[128,32], index: 8, kind: input, shape index: {}]   ;;  %s1424_s9 = inlined_call_operand.vmem [shape: f32[1,32], index: 9, kind: input, shape index: {}]   ;;  %s1425_s10 = inlined_call_operand.vmem [shape: f32[64,32], index: 10, kind: input, shape index: {}]   ;;  %s1426_s11 = inlined_call_operand.vmem [shape: f32[1,32], index: 11, kind: input, shape index: {}]   ;;  %s1427_s12 = inlined_call_operand.vmem [shape: f32[64,32], index: 12, kind: output, shape index: {}]  }
   0x1 LB: > { %s1043_s22 = sadd.s32 4294967295, %s1125_s21   ;;  %p1047_p0 = scmp.ge.s32.totalorder %s1125_s21, 1  ;;  %s1125_s21 = sphi %s1193_s21, %s22_s21  }
   0x2   : > { %p418_p1 = scmp.lt.s32.totalorder %s1125_s21, 3 }
   0x4   : > { %p419_p2 = pnand %p1047_p0, %p418_p1 }
   0x5   : > { %s1048_s29 = sshll.u32 (!%p419_p2), %s1043_s22, 2 }
   0x6   : > { %422 = sbr.rel (%p419_p2) target bundleno = 343 (0x157), region = 68  ;;  %p486_p3 = scmp.lt.s32.totalorder (!%p419_p2), %s1048_s29, 7 }
   0xb   : > { %v550_v0 = vld [vmem:[%s1421_s6 + $0x78] sm:$0xff]  ;;  %v549_v2 = vld [vmem:[%s1421_s6 + $0x70] sm:$0xff]  ;;  %v548_v4 = vld [vmem:[%s1421_s6 + $0x68] sm:$0xff]  ;;  %s1429_s29 = smov (!%p486_p3, %s1048_s29), 7  ;;  %vm551_vm0 = vcmask 523264   ;;  %v1127_v28 = vmov 0  }
   0xc   : > { %v538_v1 = vld [vmem:[%s1421_s6 + $0x38] sm:$0xff]  ;;  %572 = vmatpush.msra.mxu0 %v550_v0  ;;  %1088 = vmatpush.msra.mxu2 %v550_v0  ;;  %v537_v3 = vld [vmem:[%s1421_s6 + $0x30] sm:$0xff]  ;;  %v536_v5 = vld [vmem:[%s1421_s6 + $0x28] sm:$0xff]  ;;  %s1234_s30 = sshll.u32 %s1429_s29, 3  ;;  %vm800_vm1 = vcmask 261120  }
   0xd   : > { %613 = vmatpush.msra.mxu1 %v538_v1  ;;  %1096 = vmatpush.msra.mxu3 %v538_v1  ;;  %v547_v6 = vld [vmem:[%s1421_s6 + $0x60] sm:$0xff]  ;;  %v546_v8 = vld [vmem:[%s1421_s6 + $0x58] sm:$0xff]  ;;  %v545_v10 = vld [vmem:[%s1421_s6 + $0x50] sm:$0xff]  ;;  %s1249_s20 = scalar_lea.vmem %s1416_s1, %s1234_s30  ;;  %s1258_s26 = scalar_lea.vmem %s1415_s0, %s1234_s30 }
   0xe   : > { %573 = vmatpush.msra.mxu0 %v549_v2  ;;  %1089 = vmatpush.msra.mxu2 %v549_v2  ;;  %v535_v7 = vld [vmem:[%s1421_s6 + $0x20] sm:$0xff]  ;;  %v534_v9 = vld [vmem:[%s1421_s6 + $0x18] sm:$0xff]  ;;  %v533_v11 = vld [vmem:[%s1421_s6 + $0x10] sm:$0xff]  ;;  %s1277_s29 = scalar_lea.vmem %s1419_s4, %s1234_s30  ;;  %s507_s17 = scalar_lea.vmem %s1418_s3, %s1234_s30 }
   0xf   : > { %614 = vmatpush.msra.mxu1 %v537_v3  ;;  %1097 = vmatpush.msra.mxu3 %v537_v3  ;;  %v544_v12 = vld [vmem:[%s1421_s6 + $0x48] sm:$0xff]  ;;  %v543_v14 = vld [vmem:[%s1421_s6 + $0x40] sm:$0xff]  ;;  %v541_v17 = vld [vmem:[%s1249_s20 + $0x10] sm:$0xff]  ;;  %s501_s22 = scalar_lea.vmem %s1417_s2, %s1234_s30  ;;  %s1349_s27 = scalar_lea.vmem %s1420_s5, %s1234_s30 }
  0x10   : > { %574 = vmatpush.msra.mxu0 %v548_v4  ;;  %1090 = vmatpush.msra.mxu2 %v548_v4  ;;  %v532_v13 = vld [vmem:[%s1421_s6 + $0x8] sm:$0xff]  ;;  %v531_v15 = vld [vmem:[%s1421_s6] sm:$0xff]  ;;  %v529_v19 = vld [vmem:[%s1258_s26 + $0x10] sm:$0xff] }
  0x11   : > { %615 = vmatpush.msra.mxu1 %v536_v5  ;;  %1098 = vmatpush.msra.mxu3 %v536_v5  ;;  %v539_v16 = vld [vmem:[%s1249_s20] sm:$0xff]  ;;  %v697_v20 = vld [vmem:[%s1423_s8 + $0x78] sm:$0xff]  ;;  %v696_v22 = vld [vmem:[%s1423_s8 + $0x70] sm:$0xff] }
  0x12   : > { %575 = vmatpush.msra.mxu0 %v547_v6  ;;  %1091 = vmatpush.msra.mxu2 %v547_v6  ;;  %v527_v18 = vld [vmem:[%s1258_s26] sm:$0xff]  ;;  %v685_v21 = vld [vmem:[%s1423_s8 + $0x38] sm:$0xff]  ;;  %v684_v23 = vld [vmem:[%s1423_s8 + $0x30] sm:$0xff] }
  0x13   : > { %616 = vmatpush.msra.mxu1 %v535_v7  ;;  %1099 = vmatpush.msra.mxu3 %v535_v7  ;;  %v646_v24 = vld [vmem:[%s1277_s29] sm:$0xff]  ;;  %v648_v25 = vld [vmem:[%s1277_s29 + $0x10] sm:$0xff]  ;;  %v695_v26 = vld [vmem:[%s1423_s8 + $0x68] sm:$0xff] }
  0x14   : > { %576 = vmatpush.msra.mxu0 %v546_v8  ;;  %1092 = vmatpush.msra.mxu2 %v546_v8  ;;  %v683_v27 = vld [vmem:[%s1423_s8 + $0x28] sm:$0xff]  ;;  %v694_v29 = vld [vmem:[%s1423_s8 + $0x60] sm:$0xff]  ;;  %v542_v32 = vld [vmem:[%s1249_s20 + $0x18] sm:$0xff] }
  0x15   : > { %617 = vmatpush.msra.mxu1 %v534_v9  ;;  %1100 = vmatpush.msra.mxu3 %v534_v9  ;;  %v682_v30 = vld [vmem:[%s1423_s8 + $0x20] sm:$0xff]  ;;  %v540_v31 = vld [vmem:[%s1249_s20 + $0x8] sm:$0xff]  ;;  %v530_v34 = vld [vmem:[%s1258_s26 + $0x18] sm:$0xff] }
  0x16   : > { %577 = vmatpush.msra.mxu0 %v545_v10  ;;  %1093 = vmatpush.msra.mxu2 %v545_v10  ;;  %v528_v33 = vld [vmem:[%s1258_s26 + $0x8] sm:$0xff]  ;;  %v693_v35 = vld [vmem:[%s1423_s8 + $0x58] sm:$0xff]  ;;  %v692_v37 = vld [vmem:[%s1423_s8 + $0x50] sm:$0xff] }
  0x17   : > { %618 = vmatpush.msra.mxu1 %v533_v11  ;;  %1101 = vmatpush.msra.mxu3 %v533_v11  ;;  %v681_v36 = vld [vmem:[%s1423_s8 + $0x18] sm:$0xff]  ;;  %v680_v38 = vld [vmem:[%s1423_s8 + $0x10] sm:$0xff]  ;;  %v647_v39 = vld [vmem:[%s1277_s29 + $0x8] sm:$0xff] }
  0x18   : > { %578 = vmatpush.msra.mxu0 %v544_v12  ;;  %1094 = vmatpush.msra.mxu2 %v544_v12  ;;  %v649_v40 = vld [vmem:[%s1277_s29 + $0x18] sm:$0xff]  ;;  %v691_v41 = vld [vmem:[%s1423_s8 + $0x48] sm:$0xff]  ;;  %v690_v43 = vld [vmem:[%s1423_s8 + $0x40] sm:$0xff] }
  0x19   : > { %619 = vmatpush.msra.mxu1 %v532_v13  ;;  %1102 = vmatpush.msra.mxu3 %v532_v13  ;;  %v679_v42 = vld [vmem:[%s1423_s8 + $0x8] sm:$0xff]  ;;  %v678_v44 = vld [vmem:[%s1423_s8] sm:$0xff]  ;;  %v897_v47 = vld [vmem:[%s1349_s27 + $0x10] sm:$0xff] }
  0x1a   : > { %579 = vmatpush.msra.mxu0 %v543_v14  ;;  %1095 = vmatpush.msra.mxu2 %v543_v14  ;;  %v686_v45 = vld [vmem:[%s507_s17] sm:$0xff]  ;;  %v898_v48 = vld [vmem:[%s1349_s27 + $0x18] sm:$0xff]  ;;  %v687_v49 = vld [vmem:[%s507_s17 + $0x8] sm:$0xff] }
  0x1b   : > { %620 = vmatpush.msra.mxu1 %v531_v15  ;;  %1103 = vmatpush.msra.mxu3 %v531_v15  ;;  %v674_v46 = vld [vmem:[%s501_s22] sm:$0xff]  ;;  %v675_v50 = vld [vmem:[%s501_s22 + $0x8] sm:$0xff]  ;;  %v688_v51 = vld [vmem:[%s507_s17 + $0x10] sm:$0xff] }
  0x1c   : > { %1062 = vmatmul.msk.f32.vlgmr.msra.gmra.mxu0 %vm551_vm0, %v539_v16  ;;  %1064 = vmatmul.msk.f32.vlgmr.msra.gmra.mxu2 %vm551_vm0, %v541_v17  ;;  %v676_v52 = vld [vmem:[%s501_s22 + $0x10] sm:$0xff]  ;;  %v689_v53 = vld [vmem:[%s507_s17 + $0x18] sm:$0xff]  ;;  %v793_v57 = vld [vmem:[%s1425_s10 + $0x8] sm:$0xff] }
  0x1d   : > { %1066 = vmatmul.msk.f32.vlgmr.msra.gmra.mxu1 %vm551_vm0, %v527_v18  ;;  %1068 = vmatmul.msk.f32.vlgmr.msra.gmra.mxu3 %vm551_vm0, %v529_v19  ;;  %v677_v54 = vld [vmem:[%s501_s22 + $0x18] sm:$0xff]  ;;  %v794_v56 = vld [vmem:[%s1425_s10 + $0x10] sm:$0xff]  ;;  %v792_v58 = vld [vmem:[%s1425_s10] sm:$0xff]  ;;  %s525_s22 = scalar_lea.vmem %s1427_s12, %s1234_s30 }
  0x1e   : > { %718 = vmatpush.msrb.mxu2 %v697_v20  ;;  %759 = vmatpush.msrb.mxu3 %v685_v21  ;;  %v795_v55 = vld [vmem:[%s1425_s10 + $0x18] sm:$0xff]  ;;  %v798_v60 = vld [vmem:[%s1425_s10 + $0x30] sm:$0xff]  ;;  %v797_v61 = vld [vmem:[%s1425_s10 + $0x28] sm:$0xff] }
  0x1f   : > { %1113 = vset.pattern.permute.xlu0 %v1127_v28  ;;  %1114 = vset.pattern.permute.xlu1 %v1127_v28  ;;  %v799_v59 = vld [vmem:[%s1425_s10 + $0x38] sm:$0xff]  ;;  %v796_v62 = vld [vmem:[%s1425_s10 + $0x20] sm:$0xff] }
  0x20   : > { %719 = vmatpush.msrb.mxu2 %v696_v22  ;;  %760 = vmatpush.msrb.mxu3 %v684_v23  ;;  %v1116_v0 = vld [vmem:[%s1422_s7] ss:$0 sm:$0xff] }
  0x21   : > { %652 = vperm.xlu0 %1113, %v646_v24   ;;  %662 = vperm.xlu1 %1114, %v648_v25   ;;  %v1117_v23 = vld [vmem:[%s1424_s9] ss:$0 sm:$0xff] }
  0x22   : > { %720 = vmatpush.msrb.mxu2 %v695_v26  ;;  %761 = vmatpush.msrb.mxu3 %v683_v27  ;;  %v895_v24 = vld [vmem:[%s1349_s27] sm:$0xff] }
  0x23   : > { %1115 = vset.pattern.permute.xlu2 %v1127_v28  ;;  %866 = vmatpush.msrb.mxu1 %v795_v55 }
  0x24   : > { %721 = vmatpush.msrb.mxu2 %v694_v29  ;;  %762 = vmatpush.msrb.mxu3 %v682_v30 }
  0x25   : > { %1063 = vmatmul.msk.f32.gmra.mxu0 %vm551_vm0, %v540_v31  ;;  %1065 = vmatmul.msk.f32.gmra.mxu2 %vm551_vm0, %v542_v32 }
  0x26   : > { %1067 = vmatmul.msk.f32.gmra.mxu1 %vm551_vm0, %v528_v33  ;;  %1069 = vmatmul.msk.f32.gmra.mxu3 %vm551_vm0, %v530_v34  ;;  %v896_v33 = vld [vmem:[%s1349_s27 + $0x8] sm:$0xff] }
  0x27   : > { %722 = vmatpush.msrb.mxu2 %v693_v35  ;;  %763 = vmatpush.msrb.mxu3 %v681_v36 }
  0x28   : > { %867 = vmatpush.msrb.mxu1 %v794_v56  ;;  %825 = vmatpush.msrb.mxu0 %v799_v59 }
  0x29   : > { %723 = vmatpush.msrb.mxu2 %v692_v37  ;;  %764 = vmatpush.msrb.mxu3 %v680_v38 }
  0x2a   : > { %657 = vperm.xlu0 %1113, %v647_v39   ;;  %667 = vperm.xlu1 %1114, %v649_v40  }
  0x2b   : > { %724 = vmatpush.msrb.mxu2 %v691_v41  ;;  %765 = vmatpush.msrb.mxu3 %v679_v42 }
  0x2c   : > { %868 = vmatpush.msrb.mxu1 %v793_v57  ;;  %826 = vmatpush.msrb.mxu0 %v798_v60 }
  0x2d   : > { %725 = vmatpush.msrb.mxu2 %v690_v43  ;;  %766 = vmatpush.msrb.mxu3 %v678_v44 }
  0x2e   : > { %1070 = vmatmul.msk.f32.vlgmr.msrb.gmra.mxu2 %vm551_vm0, %v686_v45  ;;  %1074 = vmatmul.msk.f32.vlgmr.msrb.gmra.mxu3 %vm551_vm0, %v674_v46 }
  0x2f   : > { %869 = vmatpush.msrb.mxu1 %v792_v58  ;;  %827 = vmatpush.msrb.mxu0 %v797_v61 }
  0x30   : > { %901 = vperm.xlu2 %1115, %v895_v24  }
  0x31   : > { %828 = vmatpush.msrb.mxu0 %v796_v62 }
  0x32   : > { %911 = vperm.xlu0 %1113, %v897_v47   ;;  %916 = vperm.xlu1 %1114, %v898_v48  }
  0x36   : > { %1071 = vmatmul.msk.f32.gmra.mxu2 %vm551_vm0, %v687_v49  ;;  %1075 = vmatmul.msk.f32.gmra.mxu3 %vm551_vm0, %v675_v50 }
  0x38   : > { %906 = vperm.xlu2 %1115, %v896_v33  }
  0x3e   : > { %1072 = vmatmul.msk.f32.gmra.mxu2 %vm551_vm0, %v688_v51  ;;  %1076 = vmatmul.msk.f32.gmra.mxu3 %vm551_vm0, %v676_v52  ;;  %v1118_v52 = vld [vmem:[%s1426_s11] ss:$0 sm:$0xff] }
  0x46   : > { %1073 = vmatmul.msk.f32.gmra.mxu2 %vm551_vm0, %v689_v53  ;;  %1077 = vmatmul.msk.f32.gmra.mxu3 %vm551_vm0, %v677_v54 }
  0x8a   : > { %v902_v55 = vpop.permute.xlu2 %901 }
  0x93   : > { %v653_v4 = vpop.permute.xlu0 %652  ;;  %v663_v20 = vpop.permute.xlu1 %662 }
  0x99   : > { %v581_v63 = vpop.f32.mrf.mxu0 }
  0x9a   : > { %v622_v1 = vpop.f32.mrf.mxu1 }
  0x9b   : > { %v623_v2 = vadd.f32 %v622_v1, %v581_v63  ;;  %v907_v63 = vpop.permute.xlu2 %906 }
  0x9c   : > { %v658_v14 = vpop.permute.xlu0 %657  ;;  %v668_v34 = vpop.permute.xlu1 %667 }
  0x9d   : > { %v638_v3 = vadd.f32 %v1116_v0, %v623_v2 }
  0x9f   : > { %v642_v5 = vmax.f32 %v638_v3, 0.0  ;;  %v587_v6 = vpop.f32.mrf.mxu2 }
  0xa0   : > { %v628_v7 = vpop.f32.mrf.mxu3 }
  0xa1   : > { %v670_v8 = vmul.f32 %v653_v4, %v642_v5  ;;  %v629_v12 = vadd.f32 %v628_v7, %v587_v6 }
  0xa2   : > { %v584_v9 = vpop.f32.mrf.mxu0 }
  0xa3   : > { %v625_v10 = vpop.f32.mrf.mxu1  ;;  %1082 = vmatmul.msk.f32.vlgmr.msrb.gmra.mxu1 %vm800_vm1, %v670_v8  ;;  %v640_v18 = vadd.f32 %v1116_v0, %v629_v12 }
  0xa4   : > { %v626_v11 = vadd.f32 %v625_v10, %v584_v9  ;;  %v912_v7 = vpop.permute.xlu0 %911 }
  0xa5   : > { %v644_v21 = vmax.f32 %v640_v18, 0.0 }
  0xa6   : > { %v639_v13 = vadd.f32 %v1116_v0, %v626_v11 }
  0xa7   : > { %v672_v27 = vmul.f32 %v663_v20, %v644_v21 }
  0xa8   : > { %v643_v15 = vmax.f32 %v639_v13, 0.0  ;;  %v590_v16 = vpop.f32.mrf.mxu2 }
  0xa9   : > { %v631_v17 = vpop.f32.mrf.mxu3 }
  0xaa   : > { %v671_v19 = vmul.f32 %v658_v14, %v643_v15  ;;  %v632_v22 = vadd.f32 %v631_v17, %v590_v16  ;;  %v917_v14 = vpop.permute.xlu1 %916 }
  0xac   : > { %1083 = vmatmul.msk.f32.gmra.mxu1 %vm800_vm1, %v671_v19  ;;  %v641_v28 = vadd.f32 %v1116_v0, %v632_v22 }
  0xae   : > { %v645_v31 = vmax.f32 %v641_v28, 0.0 }
  0xb0   : > { %v673_v37 = vmul.f32 %v668_v34, %v645_v31 }
  0xb1   : > { %v727_v25 = vpop.f32.mrf.mxu2  ;;  %v768_v26 = vpop.f32.mrf.mxu3 }
  0xb2   : > { %v769_v29 = vadd.f32 %v768_v26, %v727_v25 }
  0xb4   : > { %v784_v30 = vadd.f32 %v1117_v23, %v769_v29  ;;  %1084 = vmatmul.msk.f32.gmra.mxu1 %vm800_vm1, %v672_v27 }
  0xb6   : > { %v788_v32 = vmax.f32 %v784_v30, 0.0 }
  0xb8   : > { %1078 = vmatmul.msk.f32.vlgmr.msrb.gmra.mxu0 %vm800_vm1, %v788_v32 }
  0xb9   : > { %v730_v35 = vpop.f32.mrf.mxu2  ;;  %v771_v36 = vpop.f32.mrf.mxu3 }
  0xba   : > { %v772_v38 = vadd.f32 %v771_v36, %v730_v35 }
  0xbc   : > { %v785_v39 = vadd.f32 %v1117_v23, %v772_v38  ;;  %1085 = vmatmul.msk.f32.gmra.mxu1 %vm800_vm1, %v673_v37 }
  0xbe   : > { %v789_v40 = vmax.f32 %v785_v39, 0.0 }
  0xc0   : > { %1079 = vmatmul.msk.f32.gmra.mxu0 %vm800_vm1, %v789_v40 }
  0xc1   : > { %v733_v41 = vpop.f32.mrf.mxu2  ;;  %v774_v42 = vpop.f32.mrf.mxu3 }
  0xc2   : > { %v775_v43 = vadd.f32 %v774_v42, %v733_v41 }
  0xc4   : > { %v786_v44 = vadd.f32 %v1117_v23, %v775_v43 }
  0xc6   : > { %v790_v45 = vmax.f32 %v786_v44, 0.0 }
  0xc8   : > { %1080 = vmatmul.msk.f32.gmra.mxu0 %vm800_vm1, %v790_v45 }
  0xc9   : > { %v736_v46 = vpop.f32.mrf.mxu2  ;;  %v777_v47 = vpop.f32.mrf.mxu3 }
  0xca   : > { %v778_v48 = vadd.f32 %v777_v47, %v736_v46 }
  0xcc   : > { %v787_v49 = vadd.f32 %v1117_v23, %v778_v48 }
  0xce   : > { %v791_v50 = vmax.f32 %v787_v49, 0.0 }
  0xd0   : > { %1081 = vmatmul.msk.f32.gmra.mxu0 %vm800_vm1, %v791_v50 }
 0x120   : > { %v871_v51 = vpop.f32.mrf.mxu1 }
 0x129   : > { %v874_v57 = vpop.f32.mrf.mxu1 }
 0x131   : > { %v877_v1 = vpop.f32.mrf.mxu1 }
 0x135   : > { %v830_v53 = vpop.f32.mrf.mxu0 }
 0x136   : > { %v872_v54 = vadd.f32 %v871_v51, %v830_v53 }
 0x138   : > { %v887_v56 = vadd.f32 %v1118_v52, %v872_v54 }
 0x139   : > { %v880_v9 = vpop.f32.mrf.mxu1 }
 0x13a   : > { %v891_v58 = vmax.f32 %v887_v56, 0.0 }
 0x13c   : > { %v919_v59 = vmul.f32 %v902_v55, %v891_v58 }
 0x13d   : > { %v833_v60 = vpop.f32.mrf.mxu0 }
 0x13e   : > { %923 = vst.msk [vmem:[%s525_s22] sm:$0xff] %vm800_vm1, %v919_v59  ;;  %v875_v61 = vadd.f32 %v874_v57, %v833_v60 }
 0x140   : > { %v888_v62 = vadd.f32 %v1118_v52, %v875_v61 }
 0x142   : > { %v892_v0 = vmax.f32 %v888_v62, 0.0 }
 0x144   : > { %v920_v2 = vmul.f32 %v907_v63, %v892_v0 }
 0x145   : > { %v836_v3 = vpop.f32.mrf.mxu0 }
 0x146   : > { %924 = vst.msk [vmem:[%s525_s22 + $0x8] sm:$0xff] %vm800_vm1, %v920_v2  ;;  %v878_v4 = vadd.f32 %v877_v1, %v836_v3 }
 0x148   : > { %v889_v5 = vadd.f32 %v1118_v52, %v878_v4 }
 0x14a   : > { %v893_v6 = vmax.f32 %v889_v5, 0.0 }
 0x14c   : > { %v921_v8 = vmul.f32 %v912_v7, %v893_v6 }
 0x14d   : > { %v839_v10 = vpop.f32.mrf.mxu0 }
 0x14e   : > { %925 = vst.msk [vmem:[%s525_s22 + $0x10] sm:$0xff] %vm800_vm1, %v921_v8  ;;  %v881_v11 = vadd.f32 %v880_v9, %v839_v10 }
 0x150   : > { %v890_v12 = vadd.f32 %v1118_v52, %v881_v11 }
 0x152   : > { %v894_v13 = vmax.f32 %v890_v12, 0.0 }
 0x154   : > { %v922_v15 = vmul.f32 %v917_v14, %v894_v13 }
 0x156   : > { %926 = vst.msk [vmem:[%s525_s22 + $0x18] sm:$0xff] %vm800_vm1, %v922_v15 }
 0x157 PF: > { %s22_s21 = sadd.s32 1, %s1125_s21  }
 0x158   : > { %p19_p4 = scmp.ge.s32.totalorder %s22_s21, 4  }
 0x15a   :  { %21 = sbr.rel (!%p19_p4) target bundleno = 1 (0x1), region = 113 }

</bundles_post_ra>
